<compile_context>
chip_gen: v7x
topology: tpu7x:2x2x1
jax: 0.10.0
libtpu: 0.0.40
codegen_flags: <defaults>
</compile_context>

<pallas_src>
import math

import jax
import jax.numpy as jnp
from jax.experimental import pallas as pl
from jax.experimental.pallas import tpu as pltpu


def _mine_kernel(xyz_ref, w_ref, b1_ref, w2t0_ref, w2t1_ref,
                 out_ref, sum0_ref, m_ref, s_ref):
    """One batch tile: fused first layer + streaming sum / logsumexp."""
    j = pl.program_id(1)                 # position along the reduction axis
    nj = pl.num_programs(1)

    @pl.when(j == 0)
    def _init():
        sum0_ref[...] = jnp.zeros((1, 1), jnp.float32)
        s_ref[...] = jnp.zeros((1, 1), jnp.float32)
        m_ref[...] = jnp.full((1, 1), -jnp.inf, jnp.float32)

    # ---- first layer: single MXU call producing [pre_T0 | pre_T1] ----
    # xyz block: (T, x_dim + 2*y_dim) bf16 ; w_big: (x_dim + 2*y_dim, 2H) bf16
    pre = jnp.dot(xyz_ref[...], w_ref[...],
                  preferred_element_type=jnp.float32)        # (T, 2H) f32
    h = jnp.maximum(pre + b1_ref[...], 0.0)                   # (T, 2H)

    # ---- second layer (VPU mul + reduce; b2 cancels, omitted) ----
    # T0 branch: column-sum first, then one masked (1,2H) weighted reduce.
    h_colsum = jnp.sum(h, axis=0, keepdims=True)               # (1, 2H)
    sum0_ref[...] += jnp.sum(h_colsum * w2t0_ref[...], axis=1, keepdims=True)

    # T1 branch: per-row masked reduce feeds a streaming logsumexp.
    t1 = jnp.sum(h * w2t1_ref[...], axis=1, keepdims=True)     # (T, 1)
    m_old = m_ref[...]
    m_new = jnp.maximum(m_old, jnp.max(t1, axis=0, keepdims=True))
    tile_exp_sum = jnp.sum(jnp.exp(t1 - m_new), axis=0, keepdims=True)
    s_ref[...] = s_ref[...] * jnp.exp(m_old - m_new) + tile_exp_sum
    m_ref[...] = m_new

    @pl.when(j == nj - 1)
    def _finalize():
        # per-split partials: [sum(T0), max(T1), sum(exp(T1 - max))]
        vals = jnp.concatenate(
            [sum0_ref[...], m_ref[...], s_ref[...]], axis=1)   # (1, 3)
        out_ref[...] = vals.reshape(1, 1, 3)


def mine_forward(x_samples, y_samples, params, shuffle_idx, *,
                 tile_n=None, num_splits=2, stream_dtype=jnp.bfloat16):
    """Wrapper: fused-input prep, tiled pallas_call, partial combine."""
    w1, b1, w2, _b2 = params                 # b2 cancels exactly in the kernel
    n, x_dim = x_samples.shape
    y_dim = y_samples.shape[-1]
    hidden = w1.shape[-1]
    fused_dim = x_dim + 2 * y_dim

    # Single streamed array: [x | y | y_shuffle]   (gather+concat+cast fuse)
    xyz = jnp.concatenate(
        [x_samples, y_samples, y_samples[shuffle_idx]], axis=-1
    ).astype(stream_dtype)                                      # (n, fused_dim)

    # Combined first-layer weights: one matmul produces both branches.
    w1x = w1[:x_dim, :]
    w1y = w1[x_dim:, :]
    zeros_h = jnp.zeros_like(w1y)
    w_big = jnp.concatenate([
        jnp.concatenate([w1x, w1x], axis=1),
        jnp.concatenate([w1y, zeros_h], axis=1),
        jnp.concatenate([zeros_h, w1y], axis=1),
    ], axis=0).astype(stream_dtype)                             # (fused_dim, 2H)

    b1_big = jnp.concatenate([b1, b1], axis=1).astype(jnp.float32)   # (1, 2H)
    w2_row = w2.reshape(1, hidden).astype(jnp.float32)
    zrow = jnp.zeros_like(w2_row)
    w2_t0 = jnp.concatenate([w2_row, zrow], axis=1)             # (1, 2H)
    w2_t1 = jnp.concatenate([zrow, w2_row], axis=1)             # (1, 2H)

    # --- tile selection: big tiles to amortize ~0.35 us per-step overhead ---
    if tile_n is None:
        tile_n = math.gcd(n, 8192)      # largest power-of-2 divisor, capped
        if tile_n != n and tile_n % 8 != 0:
            tile_n = n
    assert n % tile_n == 0, "batch must be divisible by tile_n"
    assert tile_n == n or tile_n % 8 == 0, "tile_n must be 8-aligned"
    n_tiles = n // tile_n

    if num_splits < 1 or n_tiles % num_splits != 0:
        num_splits = 1
    tiles_per_split = n_tiles // num_splits

    flops = (2 * n * fused_dim * 2 * hidden      # fused first-layer matmul
             + 6 * n * 2 * hidden)               # ReLU + second layer (both)
    bytes_accessed = (xyz.size * xyz.dtype.itemsize
                      + w_big.size * w_big.dtype.itemsize
                      + 4 * (3 * 2 * hidden + 3 * num_splits))
    cost = pl.CostEstimate(flops=flops, transcendentals=n + 2 * n_tiles,
                           bytes_accessed=bytes_accessed)

    partials = pl.pallas_call(
        _mine_kernel,
        out_shape=jax.ShapeDtypeStruct((num_splits, 1, 3), jnp.float32),
        grid_spec=pltpu.PrefetchScalarGridSpec(
            num_scalar_prefetch=0,
            grid=(num_splits, tiles_per_split),
            in_specs=[
                # one fused streamed input block per step
                pl.BlockSpec((tile_n, fused_dim),
                             lambda c, j: (c * tiles_per_split + j, 0)),
                # resident weights / biases
                pl.BlockSpec((fused_dim, 2 * hidden), lambda c, j: (0, 0)),
                pl.BlockSpec((1, 2 * hidden), lambda c, j: (0, 0)),
                pl.BlockSpec((1, 2 * hidden), lambda c, j: (0, 0)),
                pl.BlockSpec((1, 2 * hidden), lambda c, j: (0, 0)),
            ],
            out_specs=pl.BlockSpec((1, 1, 3), lambda c, j: (c, 0, 0)),
            scratch_shapes=[
                pltpu.VMEM((1, 1), jnp.float32),   # running sum of T0
                pltpu.VMEM((1, 1), jnp.float32),   # running max of T1
                pltpu.VMEM((1, 1), jnp.float32),   # running sum exp(T1 - max)
            ],
        ),
        compiler_params=pltpu.CompilerParams(
            # leading split axis may be sharded across TensorCores (v7x);
            # the inner batch axis is a carried reduction.
            dimension_semantics=("parallel", "arbitrary"),
        ),
        cost_estimate=cost,
    )(xyz, w_big, b1_big, w2_t0, w2_t1)

    # ---- combine per-split partials (tiny, done in plain JAX) ----
    parts = partials[:, 0, :]                         # (num_splits, 3)
    sum0 = jnp.sum(parts[:, 0])
    m = jnp.max(parts[:, 1])
    s = jnp.sum(parts[:, 2] * jnp.exp(parts[:, 1] - m))
    inv_n = 1.0 / n
    mean_t0 = sum0 * inv_n
    log_mean_exp_t1 = m + jnp.log(s * inv_n)
    return jnp.abs(mean_t0 - log_mean_exp_t1)


def init_params(key, x_dim, y_dim, hidden):
    """Deterministic init mimicking nn.Linear (uniform +-1/sqrt(fan_in))."""
    k1, k2, k3, k4 = jax.random.split(key, 4)
    d_in = x_dim + y_dim
    lim1 = 1.0 / (d_in ** 0.5)
    lim2 = 1.0 / (hidden ** 0.5)
    w1 = jax.random.uniform(k1, (d_in, hidden), jnp.float32, -lim1, lim1)
    b1 = jax.random.uniform(k2, (1, hidden), jnp.float32, -lim1, lim1)
    w2 = jax.random.uniform(k3, (hidden, 1), jnp.float32, -lim2, lim2)
    b2 = jax.random.uniform(k4, (1, 1), jnp.float32, -lim2, lim2)
    return w1, b1, w2, b2


if __name__ == "__main__":
    N, X_DIM, Y_DIM, HIDDEN = 64, 16, 16, 32
    TILE_N = 16        # 4 batch tiles, 2 splits -> exercises both grid axes

    key = jax.random.PRNGKey(0)
    kx, ky, kp, ki = jax.random.split(key, 4)

    x_samples = jax.random.normal(kx, (N, X_DIM), jnp.float32)
    y_samples = jax.random.normal(ky, (N, Y_DIM), jnp.float32)
    params = init_params(kp, X_DIM, Y_DIM, HIDDEN)

    # torch.randint(sample_size, (sample_size,)) equivalent (with replacement),
    # made deterministic via a PRNGKey(0)-derived key.
    shuffle_idx = jax.random.randint(ki, (N,), 0, N)

    lb = mine_forward(x_samples, y_samples, params, shuffle_idx,
                      tile_n=TILE_N, num_splits=2)
    jax.block_until_ready(lb)

    # Pure-JAX reference using the same bf16 streaming quantization as the
    # kernel (inputs and W1 cast to bf16; all downstream math in f32; includes
    # b2 and the non-streaming log(mean(exp(.)))).
    w1, b1, w2, b2 = params
    xq = x_samples.astype(jnp.bfloat16).astype(jnp.float32)
    yq = y_samples.astype(jnp.bfloat16).astype(jnp.float32)
    ysq = y_samples[shuffle_idx].astype(jnp.bfloat16).astype(jnp.float32)
    w1q = w1.astype(jnp.bfloat16).astype(jnp.float32)
    t0 = jnp.maximum(jnp.concatenate([xq, yq], -1) @ w1q + b1, 0.0) @ w2 + b2
    t1 = jnp.maximum(jnp.concatenate([xq, ysq], -1) @ w1q + b1, 0.0) @ w2 + b2
    ref = jnp.abs(jnp.mean(t0) - jnp.log(jnp.mean(jnp.exp(t1))))
    assert jnp.allclose(lb, ref, rtol=1e-3, atol=1e-4), (lb, ref)

    print("KERNEL_OK")
</pallas_src>

<mosaic_0001>
module attributes {stable_mosaic.version = 11 : i64} {
  func.func @_mine_kernel(%arg0: i32, %arg1: i32, %arg2: memref<16x48xbf16, #tpu.memory_space<vmem>>, %arg3: memref<48x64xbf16, #tpu.memory_space<vmem>>, %arg4: memref<1x64xf32, #tpu.memory_space<vmem>>, %arg5: memref<1x64xf32, #tpu.memory_space<vmem>>, %arg6: memref<1x64xf32, #tpu.memory_space<vmem>>, %arg7: memref<1x1x3xf32, #tpu.memory_space<vmem>>, %arg8: memref<1x1xf32, #tpu.memory_space<vmem>>, %arg9: memref<1x1xf32, #tpu.memory_space<vmem>>, %arg10: memref<1x1xf32, #tpu.memory_space<vmem>>) attributes {dimension_semantics = [#tpu.dimension_semantics<parallel>, #tpu.dimension_semantics<arbitrary>], iteration_bounds = array<i64: 2, 2>, scalar_prefetch = 0 : i64, scratch_operands = 3 : i64, tpu.core_type = #tpu.core_type<tc>, window_params = [{transform_indices = @transform_0, window_bounds = array<i64: 16, 48>}, {pipeline_mode = #tpu.pipeline_mode<synchronous>, transform_indices = @transform_1, window_bounds = array<i64: 48, 64>}, {pipeline_mode = #tpu.pipeline_mode<synchronous>, transform_indices = @transform_2, window_bounds = array<i64: 1, 64>}, {pipeline_mode = #tpu.pipeline_mode<synchronous>, transform_indices = @transform_3, window_bounds = array<i64: 1, 64>}, {pipeline_mode = #tpu.pipeline_mode<synchronous>, transform_indices = @transform_4, window_bounds = array<i64: 1, 64>}, {transform_indices = @transform_5, window_bounds = array<i64: 1, 1, 3>}]} {
    %c0_i32 = arith.constant 0 : i32
    %0 = arith.cmpi eq, %arg1, %c0_i32 : i32
    %1 = arith.extui %0 : i1 to i32
    %c0_i32_0 = arith.constant 0 : i32
    %2 = arith.cmpi ne, %1, %c0_i32_0 : i32
    scf.if %2 {
      %cst_29 = arith.constant 0.000000e+00 : f32
      %44 = vector.broadcast %cst_29 : f32 to vector<1x1xf32>
      %c0_30 = arith.constant 0 : index
      %c0_31 = arith.constant 0 : index
      %45 = vector.load %arg8[%c0_30, %c0_31] : memref<1x1xf32, #tpu.memory_space<vmem>>, vector<1x1xf32>
      tpu.vector_store %arg8[%c0_30, %c0_31], %44 {strides = array<i32>} : memref<1x1xf32, #tpu.memory_space<vmem>>, vector<1x1xf32>,
      %cst_32 = arith.constant 0.000000e+00 : f32
      %46 = vector.broadcast %cst_32 : f32 to vector<1x1xf32>
      %c0_33 = arith.constant 0 : index
      %c0_34 = arith.constant 0 : index
      %47 = vector.load %arg10[%c0_33, %c0_34] : memref<1x1xf32, #tpu.memory_space<vmem>>, vector<1x1xf32>
      tpu.vector_store %arg10[%c0_33, %c0_34], %46 {strides = array<i32>} : memref<1x1xf32, #tpu.memory_space<vmem>>, vector<1x1xf32>,
      %cst_35 = arith.constant 0xFF800000 : f32
      %48 = vector.broadcast %cst_35 : f32 to vector<1x1xf32>
      %c0_36 = arith.constant 0 : index
      %c0_37 = arith.constant 0 : index
      %49 = vector.load %arg9[%c0_36, %c0_37] : memref<1x1xf32, #tpu.memory_space<vmem>>, vector<1x1xf32>
      tpu.vector_store %arg9[%c0_36, %c0_37], %48 {strides = array<i32>} : memref<1x1xf32, #tpu.memory_space<vmem>>, vector<1x1xf32>,
    } else {
    }
    %c0 = arith.constant 0 : index
    %c0_1 = arith.constant 0 : index
    %3 = vector.load %arg2[%c0, %c0_1] : memref<16x48xbf16, #tpu.memory_space<vmem>>, vector<16x48xbf16>
    %c0_2 = arith.constant 0 : index
    %c0_3 = arith.constant 0 : index
    %4 = vector.load %arg3[%c0_2, %c0_3] : memref<48x64xbf16, #tpu.memory_space<vmem>>, vector<48x64xbf16>
    %cst = arith.constant dense<0.000000e+00> : vector<16x64xf32>
    %5 = tpu.matmul %3, %4, %cst {dimension_numbers = #tpu.dot_dimension_numbers<[1], [0], [0], [1], [0, 0, 1, 1], [], []>} : vector<16x48xbf16>, vector<48x64xbf16>, vector<16x64xf32> -> vector<16x64xf32>
    %c0_4 = arith.constant 0 : index
    %c0_5 = arith.constant 0 : index
    %6 = vector.load %arg4[%c0_4, %c0_5] : memref<1x64xf32, #tpu.memory_space<vmem>>, vector<1x64xf32>
    %7 = vector.broadcast %6 : vector<1x64xf32> to vector<16x64xf32>
    %8 = arith.addf %5, %7 : vector<16x64xf32>
    %cst_6 = arith.constant 0.000000e+00 : f32
    %9 = vector.broadcast %cst_6 : f32 to vector<16x64xf32>
    %10 = arith.maximumf %8, %9 : vector<16x64xf32>
    %cst_7 = arith.constant dense<0.000000e+00> : vector<64xf32>
    %11 = vector.multi_reduction <add>, %10, %cst_7 [0] : vector<16x64xf32> to vector<64xf32>
    %12 = vector.shape_cast %11 : vector<64xf32> to vector<1x64xf32>
    %c0_8 = arith.constant 0 : index
    %c0_9 = arith.constant 0 : index
    %13 = vector.load %arg8[%c0_8, %c0_9] : memref<1x1xf32, #tpu.memory_space<vmem>>, vector<1x1xf32>
    %c0_10 = arith.constant 0 : index
    %c0_11 = arith.constant 0 : index
    %14 = vector.load %arg5[%c0_10, %c0_11] : memref<1x64xf32, #tpu.memory_space<vmem>>, vector<1x64xf32>
    %15 = arith.mulf %12, %14 : vector<1x64xf32>
    %cst_12 = arith.constant dense<0.000000e+00> : vector<1xf32>
    %16 = vector.multi_reduction <add>, %15, %cst_12 [1] : vector<1x64xf32> to vector<1xf32>
    %17 = vector.shape_cast %16 : vector<1xf32> to vector<1x1xf32>
    %18 = arith.addf %13, %17 : vector<1x1xf32>
    %c0_13 = arith.constant 0 : index
    %c0_14 = arith.constant 0 : index
    %19 = vector.load %arg8[%c0_13, %c0_14] : memref<1x1xf32, #tpu.memory_space<vmem>>, vector<1x1xf32>
    tpu.vector_store %arg8[%c0_13, %c0_14], %18 {strides = array<i32>} : memref<1x1xf32, #tpu.memory_space<vmem>>, vector<1x1xf32>,
    %c0_15 = arith.constant 0 : index
    %c0_16 = arith.constant 0 : index
    %20 = vector.load %arg6[%c0_15, %c0_16] : memref<1x64xf32, #tpu.memory_space<vmem>>, vector<1x64xf32>
    %21 = vector.broadcast %20 : vector<1x64xf32> to vector<16x64xf32>
    %22 = arith.mulf %10, %21 : vector<16x64xf32>
    %cst_17 = arith.constant dense<0.000000e+00> : vector<16xf32>
    %23 = vector.multi_reduction <add>, %22, %cst_17 [1] : vector<16x64xf32> to vector<16xf32>
    %24 = vector.shape_cast %23 : vector<16xf32> to vector<16x1xf32>
    %c0_18 = arith.constant 0 : index
    %c0_19 = arith.constant 0 : index
    %25 = vector.load %arg9[%c0_18, %c0_19] : memref<1x1xf32, #tpu.memory_space<vmem>>, vector<1x1xf32>
    %cst_20 = arith.constant dense<0xFF800000> : vector<1xf32>
    %26 = vector.multi_reduction <maximumf>, %24, %cst_20 [0] : vector<16x1xf32> to vector<1xf32>
    %27 = vector.shape_cast %26 : vector<1xf32> to vector<1x1xf32>
    %28 = arith.maximumf %25, %27 : vector<1x1xf32>
    %29 = vector.broadcast %28 : vector<1x1xf32> to vector<16x1xf32>
    %30 = arith.subf %24, %29 : vector<16x1xf32>
    %31 = math.exp %30 : vector<16x1xf32>
    %cst_21 = arith.constant dense<0.000000e+00> : vector<1xf32>
    %32 = vector.multi_reduction <add>, %31, %cst_21 [0] : vector<16x1xf32> to vector<1xf32>
    %33 = vector.shape_cast %32 : vector<1xf32> to vector<1x1xf32>
    %c0_22 = arith.constant 0 : index
    %c0_23 = arith.constant 0 : index
    %34 = vector.load %arg10[%c0_22, %c0_23] : memref<1x1xf32, #tpu.memory_space<vmem>>, vector<1x1xf32>
    %35 = arith.subf %25, %28 : vector<1x1xf32>
    %36 = math.exp %35 : vector<1x1xf32>
    %37 = arith.mulf %34, %36 : vector<1x1xf32>
    %38 = arith.addf %37, %33 : vector<1x1xf32>
    %c0_24 = arith.constant 0 : index
    %c0_25 = arith.constant 0 : index
    %39 = vector.load %arg10[%c0_24, %c0_25] : memref<1x1xf32, #tpu.memory_space<vmem>>, vector<1x1xf32>
    tpu.vector_store %arg10[%c0_24, %c0_25], %38 {strides = array<i32>} : memref<1x1xf32, #tpu.memory_space<vmem>>, vector<1x1xf32>,
    %c0_26 = arith.constant 0 : index
    %c0_27 = arith.constant 0 : index
    %40 = vector.load %arg9[%c0_26, %c0_27] : memref<1x1xf32, #tpu.memory_space<vmem>>, vector<1x1xf32>
    tpu.vector_store %arg9[%c0_26, %c0_27], %28 {strides = array<i32>} : memref<1x1xf32, #tpu.memory_space<vmem>>, vector<1x1xf32>,
    %c1_i32 = arith.constant 1 : i32
    %41 = arith.cmpi eq, %arg1, %c1_i32 : i32
    %42 = arith.extui %41 : i1 to i32
    %c0_i32_28 = arith.constant 0 : i32
    %43 = arith.cmpi ne, %42, %c0_i32_28 : i32
    scf.if %43 {
      %c0_29 = arith.constant 0 : index
      %c0_30 = arith.constant 0 : index
      %44 = vector.load %arg8[%c0_29, %c0_30] : memref<1x1xf32, #tpu.memory_space<vmem>>, vector<1x1xf32>
      %c0_31 = arith.constant 0 : index
      %c0_32 = arith.constant 0 : index
      %45 = vector.load %arg9[%c0_31, %c0_32] : memref<1x1xf32, #tpu.memory_space<vmem>>, vector<1x1xf32>
      %c0_33 = arith.constant 0 : index
      %c0_34 = arith.constant 0 : index
      %46 = vector.load %arg10[%c0_33, %c0_34] : memref<1x1xf32, #tpu.memory_space<vmem>>, vector<1x1xf32>
      %47 = tpu.concatenate %44, %45, %46 in 1 : vector<1x1xf32>, vector<1x1xf32>, vector<1x1xf32> -> vector<1x3xf32>
      %48 = vector.shape_cast %47 : vector<1x3xf32> to vector<1x1x3xf32>
      %c0_35 = arith.constant 0 : index
      %c0_36 = arith.constant 0 : index
      %c0_37 = arith.constant 0 : index
      %49 = vector.load %arg7[%c0_35, %c0_36, %c0_37] : memref<1x1x3xf32, #tpu.memory_space<vmem>>, vector<1x1x3xf32>
      tpu.vector_store %arg7[%c0_35, %c0_36, %c0_37], %48 {strides = array<i32>} : memref<1x1x3xf32, #tpu.memory_space<vmem>>, vector<1x1x3xf32>,
    } else {
    }
    return
  }
  func.func @transform_0(%arg0: i32, %arg1: i32) -> (i32, i32) {
    %c2_i32 = arith.constant 2 : i32
    %0 = arith.muli %arg0, %c2_i32 : i32
    %1 = arith.addi %0, %arg1 : i32
    %c0_i32 = arith.constant 0 : i32
    %c0_i32_0 = arith.constant 0 : i32
    return %1, %c0_i32 : i32, i32
  }
  func.func @transform_1(%arg0: i32, %arg1: i32) -> (i32, i32) {
    %c0_i32 = arith.constant 0 : i32
    %c0_i32_0 = arith.constant 0 : i32
    %c0_i32_1 = arith.constant 0 : i32
    return %c0_i32, %c0_i32_0 : i32, i32
  }
  func.func @transform_2(%arg0: i32, %arg1: i32) -> (i32, i32) {
    %c0_i32 = arith.constant 0 : i32
    %c0_i32_0 = arith.constant 0 : i32
    %c0_i32_1 = arith.constant 0 : i32
    return %c0_i32, %c0_i32_0 : i32, i32
  }
  func.func @transform_3(%arg0: i32, %arg1: i32) -> (i32, i32) {
    %c0_i32 = arith.constant 0 : i32
    %c0_i32_0 = arith.constant 0 : i32
    %c0_i32_1 = arith.constant 0 : i32
    return %c0_i32, %c0_i32_0 : i32, i32
  }
  func.func @transform_4(%arg0: i32, %arg1: i32) -> (i32, i32) {
    %c0_i32 = arith.constant 0 : i32
    %c0_i32_0 = arith.constant 0 : i32
    %c0_i32_1 = arith.constant 0 : i32
    return %c0_i32, %c0_i32_0 : i32, i32
  }
  func.func @transform_5(%arg0: i32, %arg1: i32) -> (i32, i32, i32) {
    %c0_i32 = arith.constant 0 : i32
    %c0_i32_0 = arith.constant 0 : i32
    %c0_i32_1 = arith.constant 0 : i32
    return %arg0, %c0_i32, %c0_i32_0 : i32, i32, i32
  }
}

</mosaic_0001>

<bundles_post_ra>
// kernel: tpu_custom_call.1
= control target key start
LH: loop header
LB: loop body
LE: loop exit
PB: predicated region body
PF: predicated region fallthrough
CT: control target
= control target key end

     0   :  { %10 = vsyncpa [#allocation6], 0  ;;  %s943_s0 = inlined_call_operand.vmem [shape: bf16[64,48], index: 0, kind: input, shape index: {}]   ;;  %s944_s1 = inlined_call_operand.vmem [shape: bf16[48,64], index: 1, kind: input, shape index: {}]   ;;  %s945_s2 = inlined_call_operand.vmem [shape: f32[1,64], index: 2, kind: input, shape index: {}]   ;;  %s946_s3 = inlined_call_operand.vmem [shape: f32[1,64], index: 3, kind: input, shape index: {}]   ;;  %s947_s4 = inlined_call_operand.vmem [shape: f32[1,64], index: 4, kind: input, shape index: {}]   ;;  %s948_s5 = inlined_call_operand.hbm [shape: f32[2,1,3], index: 5, kind: output, shape index: {}]  }
   0x1   :  { %12 = vsyncpa [#allocation6 + $0x1], 0  ;;  %s783_s18 = smov 0   ;;  %s785_s19 = smov 0  }
   0x2   :  { %s787_s20 = smov 0   ;;  %s789_s21 = smov 0  }
   0x3   :  { %s791_s22 = smov 0   ;;  %s793_s23 = smov 0  }
   0x4   :  { %s795_s24 = smov 0   ;;  %s797_s25 = smov 0  }
   0x5 LB: > { %s525_s26 = sadd.s32 4294967295, %s744_s25   ;;  %s526_s27 = sadd.s32 4294967294, %s744_s25   ;;  %s744_s25 = sphi %s797_s25, %s18_s25   ;;  %s740_s24 = sphi %s795_s24, %s957_s24   ;;  %s736_s23 = sphi %s793_s23, %s956_s23   ;;  %s732_s22 = sphi %s791_s22, %s955_s22   ;;  %s728_s21 = sphi %s789_s21, %s954_s21   ;;  %s724_s20 = sphi %s787_s20, %s953_s20   ;;  %s720_s19 = sphi %s785_s19, %s952_s19   ;;  %s716_s18 = sphi %s783_s18, %s951_s18  }
   0x6   : > { %s27_s28 = sadd.s32 1, %s736_s23  ;;  %s30_s29 = sadd.s32 1, %s740_s24 }
   0x7   : > { %p28_p0 = scmp.ge.s32.totalorder %s27_s28, 2  ;;  %p161_p1 = scmp.ne.s32.totalorder %s724_s20, %s720_s19 }
   0x8   : > { %p162_p2 = scmp.eq.s32.totalorder %s525_s26, 3  ;;  %p167_p4 = scmp.ne.s32.totalorder %s720_s19, %s716_s18 }
   0x9   : > { %s959_s28 = smov (%p28_p0, %s27_s28), 0  ;;  %s961_s29 = smov (!%p28_p0, %s30_s29), %s740_s24 }
   0xa   : > { %p832_p3 = por %p162_p2, %p161_p1  ;;  %p32_p5 = scmp.ge.s32.totalorder %s961_s29, 2 }
   0xb   : > { %p168_p6 = scmp.eq.s32.totalorder %s526_s27, 3  ;;  %p531_p7 = scmp.ge.s32.totalorder %s744_s25, 1 }
   0xc   : > { %p211_p8 = scmp.lt.s32.totalorder %s744_s25, 5  ;;  %s963_s29 = smov (%p32_p5, %s961_s29), 0 }
   0xd   : > { %p842_p9 = por %p168_p6, %p167_p4  ;;  %s148_s7 = ssub.s32 %s740_s24, %s963_s29 }
   0xe   : > { %p212_p10 = pnand %p531_p7, %p211_p8  ;;  %s151_s8 = sadd.s32 1, %s724_s20 }
   0xf   : > { %p149_p11 = scmp.eq.s32.totalorder %s148_s7, 0  ;;  %s238_s10 = sand.u32 (!%p212_p10), 1, %s720_s19  }
  0x10   : > { %215 = sbr.rel (%p212_p10) target bundleno = 608 (0x260), region = 40  ;;  %s532_s11 = sshll.u32 (!%p212_p10), %s732_s22, 1 }
  0x11   : > { %s850_s9 = scalar_select %p149_p11, %s724_s20, %s151_s8  }
  0x12   : > { %s241_s12 = sadd.s32 (!%p212_p10), %s728_s21, %s532_s11  ;;  %s860_s26 = scalar_lea.vmem (!%p212_p10), [#allocation5], %s238_s10 }
  0x13   : > { %s533_s13 = sshll.u32 (!%p212_p10), %s241_s12, 1  ;;  %p535_p13 = scmp.ne.s32.totalorder (!%p212_p10), %s728_s21, 0 }
  0x14   : > { %p243_p12 = scmp.lt.s32.totalorder (!%p212_p10), %s533_s13, 7 }
  0x17   : > { %s965_s13 = smov (!%p243_p12, %s533_s13), 7  ;;  %254 = sbr.rel (%p535_p13) target bundleno = 30 (0x1e), region = 44 }
  0x18   : > { %s534_s14 = sshll.u32 %s965_s13, 2  ;;  %vm255_vm0 = vcmask (!%p535_p13), 0   ;;  %v746_v0 = vmov (!%p535_p13), 0.0   ;;  %v747_v1 = vmov (!%p535_p13), -inf  }
  0x19   : > { %s246_s17 = scalar_lea.vmem %s943_s0, %s534_s14  ;;  %256 = vst.msk [vmem:[#allocation2] sm:$0x1] (!%p535_p13), %vm255_vm0, %v746_v0  ;;  %257 = vst.msk [vmem:[#allocation4] sm:$0x1] (!%p535_p13), %vm255_vm0, %v746_v0 }
  0x1a   : > { %258 = vst.msk [vmem:[#allocation3] sm:$0x1] (!%p535_p13), %vm255_vm0, %v747_v1 }
  0x1e PF: > { %v640_v2 = vld [vmem:[%s944_s1] sm:$0xff]   ;;  %v748_v3 = vmov 0.0   ;;  %v641_v4 = vld [vmem:[%s944_s1 + $0x8] sm:$0xff]   ;;  %vm749_vm1 = vmmov 0   ;;  %v642_v5 = vld [vmem:[%s944_s1 + $0x10] sm:$0xff]   ;;  %vm297_vm2 = vcmask 392192   ;;  %v389_v37 = vlaneseq }
  0x1f   : > { %553 = vmatprep.subr.bf16.mxu0 %v748_v3  ;;  %559 = vmatprep.mubr.msk.bf16.mxu0 %vm749_vm1, %v748_v3  ;;  %v643_v6 = vld [vmem:[%s246_s17] sm:$0xff]   ;;  %vm344_vm3 = vcmask 523264   ;;  %vm357_vm4 = vcmask 516096   ;;  %vm362_vm5 = vcmask 0   ;;  %vm400_vm6 = vcmask 7168   ;;  %p543_p0 = scmp.ne.s32.totalorder %s728_s21, 1 }
  0x20   : > { %554 = vmatpush3.bf16.msra.mxu0 %v640_v2  ;;  %v536_v7 = vld [vmem:[%s945_s2] ss:$0 sm:$0xff]  ;;  %v390_v40 = vshrl.u32 %v389_v37, 7  ;;  %s750_s8 = smov (!%p543_p0), 1   ;;  %s751_s11 = smov (!%p543_p0), 2   ;;  %vm442_vm7 = vcmask (!%p543_p0), 15360  }
  0x21   : > { %555 = vmatprep.subr.bf16.mxu0 %v748_v3  ;;  %v542_v12 = vld [vmem:[%s947_s4] ss:$0 sm:$0xff]  ;;  %v379_v44 = vld [vmem:[#allocation3] sm:$0x1]  ;;  %vm444_vm8 = vcmask (!%p543_p0), 16384  }
  0x22   : > { %v355_v29 = vld [vmem:[%s946_s3] sm:$0x1]  ;;  %v391_v45 = vsub.s32 0, %v390_v40 }
  0x23   : > { %v354_v43 = vld [vmem:[#allocation2] sm:$0x1] }
  0x24   : > { %556 = vmatpush3.bf16.msra.mxu0 %v641_v4 }
  0x25   : > { %557 = vmatprep.subr.bf16.mxu0 %v748_v3  ;;  %v410_v3 = vld [vmem:[#allocation4] sm:$0x1] }
  0x28   : > { %558 = vmatpush3.bf16.msra.mxu0 %v642_v5 }
  0x2b   : > { %560 = vmatmul.mubr.msk.bf16.vlgmr.msra.gmra.mrb[0].mxu0 %vm297_vm2, %v643_v6 }
  0xfe   : > { %v335_v8 = vpop.f32.mrb[0].mxu0 }
  0xff   : > { %v336_v9 = vadd.f32 %v536_v7, %v335_v8  ;;  %v561_v10 = vpop.f32.mrb[1].mxu0 }
 0x100   : > { %v338_v11 = vpop.f32.mrb[2].mxu0 }
 0x101   : > { %v342_v13 = vmax.f32 %v336_v9, 0.0  ;;  %v339_v14 = vadd.f32 %v536_v7, %v338_v11  ;;  %v562_v15 = vpop.f32.mrb[3].mxu0 }
 0x103   : > { %v343_v16 = vmax.f32 %v339_v14, 0.0  ;;  %v371_v17 = vmul.f32 %v542_v12, %v342_v13  ;;  %v345_v18 = vsel %vm344_vm3, %v342_v13, 0.0 }
 0x105   : > { %v346_v19 = vsel %vm344_vm3, %v343_v16, 0.0  ;;  %v373_v20 = vsel %vm344_vm3, %v371_v17, 0.0  ;;  %v372_v21 = vmul.f32 %v542_v12, %v343_v16 }
 0x106   : > { %v347_v22 = vadd.f32 %v346_v19, %v345_v18  ;;  %374 = vadd.xlane.f32.xlu0 %v373_v20 }
 0x107   : > { %v376_v24 = vsel %vm344_vm3, %v372_v21, 0.0 }
 0x108   : > { %v348_v23 = vrot.slane %v347_v22, 4 }
 0x10a   : > { %v349_v25 = vadd.f32 %v348_v23, %v347_v22  ;;  %377 = vadd.xlane.f32.xlu0 %v376_v24 }
 0x10c   : > { %v350_v26 = vrot.slane %v349_v25, 2 }
 0x10e   : > { %v351_v27 = vadd.f32 %v350_v26, %v349_v25 }
 0x110   : > { %v352_v28 = vrot.slane %v351_v27, 1 }
 0x112   : > { %v353_v30 = vadd.f32 %v352_v28, %v351_v27 }
 0x114   : > { %v356_v31 = vmul.f32 %v355_v29, %v353_v30 }
 0x116   : > { %v358_v32 = vsel %vm357_vm4, %v356_v31, 0.0 }
 0x117   : > { %359 = vadd.xlane.f32.xlu1 %v358_v32 }
 0x193   : > { %v375_v33 = vpop.xlane.xlu0 %374 }
 0x197   : > { %v378_v34 = vpop.xlane.xlu0 %377 }
 0x198   : > { %v380_v35 = vmax.f32 %v375_v33, %v378_v34 }
 0x19a   : > { %v381_v36 = vrot.slane %v380_v35, 4 }
 0x19c   : > { %v382_v38 = vmax.f32 %v380_v35, %v381_v36 }
 0x19e   : > { %v383_v39 = vrot.slane %v382_v38, 2 }
 0x1a0   : > { %v384_v41 = vmax.f32 %v382_v38, %v383_v39 }
 0x1a2   : > { %v385_v42 = vrot.slane %v384_v41, 1 }
 0x1a4   : > { %v386_v46 = vmax.f32 %v384_v41, %v385_v42  ;;  %v360_v47 = vpop.xlane.xlu1 %359 }
 0x1a5   : > { %v361_v48 = vadd.f32 %v360_v47, %v354_v43 }
 0x1a6   : > { %v387_v49 = vmax.f32 %v379_v44, %v386_v46 }
 0x1a7   : > { %363 = vst.msk [vmem:[#allocation2] sm:$0x1] %vm362_vm5, %v361_v48 }
 0x1a8   : > { %v392_v50 = vrot.slane %v387_v49, %v391_v45  ;;  %417 = vst.msk [vmem:[#allocation3] sm:$0x1] %vm362_vm5, %v387_v49  ;;  %v411_v55 = vsub.f32 %v379_v44, %v387_v49 }
 0x1aa   : > { %v394_v51 = vsub.f32 %v375_v33, %v392_v50  ;;  %v395_v52 = vsub.f32 %v378_v34, %v392_v50  ;;  %v412_v56 = vmul.f32 1.442695, %v411_v55 }
 0x1ac   : > { %v396_v53 = vmul.f32 1.442695, %v394_v51  ;;  %v398_v54 = vmul.f32 1.442695, %v395_v52 }
 0x1ae   : > { %644 = vpow2.f32 %v396_v53  ;;  %v422_v11 = vld [vmem:[#allocation2] sm:$0x1] (!%p543_p0) }
 0x1af   : > { %646 = vpow2.f32 %v398_v54  ;;  %v544_v8 = vld [vmem:[#allocation3] ss:$0 sm:$0xff] (!%p543_p0) }
 0x1b0   : > { %648 = vpow2.f32 %v412_v56  ;;  %430 = vrot.lane.b32.xlu0 (!%p543_p0), %v544_v8, %s750_s8 }
 0x1b8   : > { %v645_v57 = vpop.eup %644 }
 0x1b9   : > { %v647_v58 = vpop.eup %646  ;;  %v401_v59 = vsel %vm400_vm6, %v645_v57, 0.0 }
 0x1ba   : > { %v402_v60 = vsel %vm400_vm6, %v647_v58, 0.0  ;;  %v649_v2 = vpop.eup %648 }
 0x1bb   : > { %v403_v61 = vadd.f32 %v402_v60, %v401_v59  ;;  %v414_v6 = vmul.f32 %v649_v2, %v410_v3 }
 0x1bd   : > { %v404_v62 = vrot.slane %v403_v61, 4 }
 0x1bf   : > { %v405_v63 = vadd.f32 %v404_v62, %v403_v61 }
 0x1c1   : > { %v406_v0 = vrot.slane %v405_v63, 2 }
 0x1c3   : > { %v407_v1 = vadd.f32 %v406_v0, %v405_v63 }
 0x1c5   : > { %v408_v4 = vrot.slane %v407_v1, 1  ;;  %421 = sbr.rel (%p543_p0) target bundleno = 584 (0x248), region = 48 }
 0x1c7   : > { %v409_v5 = vadd.f32 %v408_v4, %v407_v1 }
 0x1c9   : > { %v415_v7 = vadd.f32 %v414_v6, %v409_v5 }
 0x1cb   : > { %416 = vst.msk [vmem:[#allocation4] sm:$0x1] %vm362_vm5, %v415_v7 }
 0x1d2   : > { %v545_v9 = vld [vmem:[#allocation4] ss:$0 sm:$0xff] }
 0x1d3   : > { %438 = vrot.lane.b32.xlu0 %v545_v9, %s751_s11 }
 0x222   : > { %v431_v10 = vpop.permute.xlu0 %430 }
 0x223   : > { %v441_v12 = vsel %vm400_vm6, %v422_v11, %v431_v10 }
 0x245   : > { %v439_v13 = vpop.permute.xlu0 %438 }
 0x246   : > { %v443_v14 = vsel %vm442_vm7, %v441_v12, %v439_v13 }
 0x247   : > { %445 = vst.msk [vmem:[%s860_s26] sm:$0x1] %vm444_vm8, %v443_v14 }
 0x248 PF: > { %s546_s21 = sshll.u32 %s732_s22, 4  ;;  %s459_s15 = sshll.u32 %s860_s26, 4  ;;  %s460_s15 = int_to_ptr.vmem [resolvable:$true] %s459_s15 }
 0x249   : > { %s893_s14 = scalar_lea.hbm %s948_s5, %s546_s21  ;;  %s447_s16 = scalar_lea.sflag [#allocation6], %s238_s10 }
 0x24a   : > { %s650_s27 = scalar_lea.vmem %s460_s15, 16  ;;  %s752_s17 = smov [#allocation5]  }
 0x24b   : > { %p651_p1 = scmp.ne.s32.totalorder %s460_s15, %s650_s27  ;;  %s654_s7 = sshll.u32 %s752_s17, 4  ;;  %s655_s7 = int_to_ptr.vmem [resolvable:$false] %s654_s7 }
 0x24c   : > { %s656_s8 = scalar_lea.vmem %s655_s7, 32  ;;  %p657_p5 = scmp.lt.s32.totalorder %s460_s15, %s655_s7 }
 0x24d   : > { %p652_p2 = pnand %p651_p1, %p832_p3  ;;  %p658_p6 = scmp.lt.s32.totalorder %s656_s8, %s650_s27 }
 0x24f   : > { %p653_p4 = pneg %p652_p2  ;;  %p659_p7 = por %p658_p6, %p657_p5 }
 0x251   : > { %p660_p8 = pnand %p659_p7, %p653_p4 }
 0x253   : > { %663 = shalt.err (!%p660_p8)
}
 0x254   : > { %s664_s22 = scalar_lea.hbm %s893_s14, 16  ;;  %s668_s11 = scalar_lea.hbm %s948_s5, 32 }
 0x255   : > { %p665_p10 = scmp.ne.s32.totalorder %s893_s14, %s664_s22  ;;  %p669_p13 = scmp.lt.u32.totalorder %s893_s14, %s948_s5 }
 0x256   : > { %p670_p0 = scmp.lt.u32.totalorder %s668_s11, %s664_s22  ;;  %p672_p2 = scmp.lt.u32.totalorder %s664_s22, %s893_s14 }
 0x257   : > { %p666_p11 = pnand %p665_p10, %p832_p3 }
 0x258   : > { %p671_p1 = por %p670_p0, %p669_p13 }
 0x259   : > { %p667_p12 = pneg %p666_p11 }
 0x25a   : > { %p673_p4 = por %p672_p2, %p671_p1 }
 0x25c   : > { %p674_p5 = pnand %p673_p4, %p667_p12 }
 0x25e   : > { %677 = shalt.err (!%p674_p5)
}
 0x25f   : > { %563 = dma.vmem_to_hbm [thread:$0]  (%p832_p3), %s460_s15, 16, %s893_s14, %s447_s16  }
 0x260 PF: > { %p569_p6 = scmp.ge.s32.totalorder %s744_s25, 2  ;;  %s471_s13 = sand.u32 1, %s716_s18  }
 0x261   : > { %s472_s27 = scalar_lea.sflag [#allocation6], %s471_s13 }
 0x262   : > { %p566_p7 = pnand %p569_p6, %p842_p9 }
 0x264   : > { %711 = dma.done.wait (!%p566_p7), %s472_s27, 16  }
 0x265   : > { %713 = vsyncadd (!%p566_p7), %s472_s27, 4294967280  ;;  %s18_s25 = sadd.s32 1, %s744_s25   ;;  %s951_s18 = smov %s720_s19 }
 0x266   : > { %p15_p8 = scmp.ge.s32.totalorder %s18_s25, 6   ;;  %s952_s19 = smov %s724_s20 }
 0x267   : > { %s953_s20 = smov %s850_s9  ;;  %s954_s21 = smov %s736_s23 }
 0x268   : > { %s955_s22 = smov %s740_s24  ;;  %s956_s23 = smov %s959_s28 }
 0x269   : > { %s957_s24 = smov %s963_s29  ;;  %17 = sbr.rel (!%p15_p8) target bundleno = 5 (0x5), region = 83 }
 0x270   :  { %476 = vsyncpa [#allocation6], 1 }
 0x271   :  { %478 = vsyncpa [#allocation6 + $0x1], 1 }

</bundles_post_ra>
